<compile_context>
chip_gen: v7x
topology: tpu7x:2x2x1
jax: 0.10.0
libtpu: 0.0.40
codegen_flags: <defaults>
</compile_context>

<pallas_src>
import jax
import jax.numpy as jnp
from jax.experimental import pallas as pl
from jax.experimental.pallas import tpu as pltpu


def _linear_encoder_kernel(x_ref, w_ref, b_ref, o_ref):
    # bf16 x (TM, K) @ bf16 W^T (K, Np) on the MXU, f32 accumulation.
    acc = jnp.dot(x_ref[...], w_ref[...], preferred_element_type=jnp.float32)
    o_ref[...] = (acc + b_ref[...]).astype(o_ref.dtype)


def _round_up(v, m):
    return ((v + m - 1) // m) * m


def _pick_tm(Bp, tm_max):
    """Largest multiple-of-8 divisor of Bp that is <= tm_max and leaves
    grid_m >= 2 whenever Bp >= 16 (so both v7x TensorCores get work)."""
    if Bp <= 8:
        return Bp
    limit = min(tm_max, Bp // 2)          # force at least two batch tiles
    m = Bp // 8
    best = 8
    for d in range(1, m + 1):
        tm = 8 * d
        if m % d == 0 and tm <= limit:
            best = max(best, tm)
    return best


def linear_encoder_forward(x, weight, bias, *, tm_max=1024,
                           compute_dtype=jnp.bfloat16):
    """Pallas forward pass of LinearEncoder.

    Args:
      x:      (B, len_sequence, alphabet_size) float32
      weight: (embedding_size, in_features)    float32   (PyTorch layout)
      bias:   (embedding_size,)                float32
    Returns:
      emb:    (B, embedding_size) float32
    """
    B = x.shape[0]
    x_flat = x.reshape(B, -1)                      # (B, K) -- glue, plain JAX
    K = x_flat.shape[1]
    N, Kw = weight.shape
    assert Kw == K, (Kw, K)

    # Pad N to a lane-dense multiple of 128 (unmasked output vst); pad B only
    # to the sublane multiple of 8.  K stays unpadded: full-dim blocks are
    # legal and padding would inflate the dominant x HBM stream.
    Np = _round_up(N, 128)
    Bp = _round_up(B, 8)
    TM = _pick_tm(Bp, tm_max)
    grid_m = Bp // TM

    # Streamed operands in bf16 (f32 MXU accumulation); bias stays f32.
    x_p = x_flat
    if Bp != B:
        x_p = jnp.pad(x_p, ((0, Bp - B), (0, 0)))
    x_p = x_p.astype(compute_dtype)

    # One-time host-side transpose to (K, Np): MXU-preferred (M,K)x(K,N) form,
    # no per-step in-kernel transpose of the constant weight block.
    w_t = jnp.pad(weight.T, ((0, 0), (0, Np - N))).astype(compute_dtype)
    b_p = jnp.pad(bias, (0, Np - N)).reshape(1, Np).astype(jnp.float32)

    # VMEM budget sized to the actual buffers (x/out double-buffered,
    # weight/bias single-buffered), with generous headroom; clamped so it is
    # valid on v7x (64 MiB/TC) while still raising v5e's 16 MiB default.
    itemsize = jnp.dtype(compute_dtype).itemsize
    vmem_bytes = (2 * TM * K * itemsize        # x tiles (double-buffered)
                  + 1 * K * Np * itemsize      # weight (single-buffered)
                  + 1 * Np * 4                 # bias   (single-buffered)
                  + 2 * TM * Np * 4)           # out tiles (double-buffered)
    vmem_limit = int(min(max(2 * vmem_bytes + (2 << 20), 32 << 20), 64 << 20))

    out = pl.pallas_call(
        _linear_encoder_kernel,
        out_shape=jax.ShapeDtypeStruct((Bp, Np), jnp.float32),
        grid_spec=pl.GridSpec(
            grid=(grid_m,),
            in_specs=[
                # Streamed x tiles (double-buffered by the pipeline).
                pl.BlockSpec((TM, K), lambda i: (i, 0)),
                # Constant weight / bias: VMEM-resident, single-buffered.
                pl.BlockSpec((K, Np), lambda i: (0, 0),
                             pipeline_mode=pl.Buffered(1)),
                pl.BlockSpec((1, Np), lambda i: (0, 0),
                             pipeline_mode=pl.Buffered(1)),
            ],
            out_specs=pl.BlockSpec((TM, Np), lambda i: (i, 0)),
        ),
        compiler_params=pltpu.CompilerParams(
            # Row-parallel over the batch: shards across v7x's 2 TensorCores
            # (grid_m >= 2 whenever Bp >= 16); harmless no-op on v5e/v6e.
            dimension_semantics=("parallel",),
            vmem_limit_bytes=vmem_limit,
        ),
    )(x_p, w_t, b_p)

    # Cheap views: Bp - B <= 7 rows, Np - N < 128 cols.
    return out[:B, :N]


if __name__ == "__main__":
    # Small shapes consistent with the module: sequences over a 4-letter alphabet.
    B = 2
    len_sequence = 8
    alphabet_size = 4
    embedding_size = 32
    in_features = alphabet_size * len_sequence

    key = jax.random.PRNGKey(0)
    kx, kw, kb = jax.random.split(key, 3)

    # One-hot-ish float input (B, len_sequence, alphabet_size), like a one-hot DNA seq.
    x = jax.random.uniform(kx, (B, len_sequence, alphabet_size), dtype=jnp.float32)

    # Deterministic param init mimicking nn.Linear default: U(-1/sqrt(in), 1/sqrt(in)).
    bound = 1.0 / jnp.sqrt(jnp.float32(in_features))
    weight = jax.random.uniform(
        kw, (embedding_size, in_features), dtype=jnp.float32, minval=-bound, maxval=bound
    )
    bias = jax.random.uniform(
        kb, (embedding_size,), dtype=jnp.float32, minval=-bound, maxval=bound
    )

    emb = linear_encoder_forward(x, weight, bias)
    emb = jax.block_until_ready(emb)

    # Cross-check against plain f32 JAX reference.  Tolerance loosened because
    # the streamed operands are bf16-quantized (accumulation is still f32).
    ref = x.reshape(B, -1) @ weight.T + bias
    assert emb.shape == (B, embedding_size)
    assert jnp.allclose(emb, ref, atol=2e-2, rtol=2e-2), float(jnp.max(jnp.abs(emb - ref)))

    print("KERNEL_OK")
</pallas_src>

<mosaic_0001>
module attributes {stable_mosaic.version = 11 : i64} {
  func.func @_linear_encoder_kernel(%arg0: i32, %arg1: memref<8x32xbf16, #tpu.memory_space<vmem>>, %arg2: memref<32x128xbf16, #tpu.memory_space<vmem>>, %arg3: memref<1x128xf32, #tpu.memory_space<vmem>>, %arg4: memref<8x128xf32, #tpu.memory_space<vmem>>) attributes {dimension_semantics = [#tpu.dimension_semantics<parallel>], iteration_bounds = array<i64: 1>, scalar_prefetch = 0 : i64, scratch_operands = 0 : i64, tpu.core_type = #tpu.core_type<tc>, window_params = [{transform_indices = @transform_0, window_bounds = array<i64: 8, 32>}, {pipeline_mode = #tpu.pipeline_mode<synchronous>, transform_indices = @transform_1, window_bounds = array<i64: 32, 128>}, {pipeline_mode = #tpu.pipeline_mode<synchronous>, transform_indices = @transform_2, window_bounds = array<i64: 1, 128>}, {transform_indices = @transform_3, window_bounds = array<i64: 8, 128>}]} {
    %c0 = arith.constant 0 : index
    %c0_0 = arith.constant 0 : index
    %0 = vector.load %arg1[%c0, %c0_0] : memref<8x32xbf16, #tpu.memory_space<vmem>>, vector<8x32xbf16>
    %c0_1 = arith.constant 0 : index
    %c0_2 = arith.constant 0 : index
    %1 = vector.load %arg2[%c0_1, %c0_2] : memref<32x128xbf16, #tpu.memory_space<vmem>>, vector<32x128xbf16>
    %cst = arith.constant dense<0.000000e+00> : vector<8x128xf32>
    %2 = tpu.matmul %0, %1, %cst {dimension_numbers = #tpu.dot_dimension_numbers<[1], [0], [0], [1], [0, 0, 1, 1], [], []>} : vector<8x32xbf16>, vector<32x128xbf16>, vector<8x128xf32> -> vector<8x128xf32>
    %c0_3 = arith.constant 0 : index
    %c0_4 = arith.constant 0 : index
    %3 = vector.load %arg3[%c0_3, %c0_4] : memref<1x128xf32, #tpu.memory_space<vmem>>, vector<1x128xf32>
    %4 = vector.broadcast %3 : vector<1x128xf32> to vector<8x128xf32>
    %5 = arith.addf %2, %4 : vector<8x128xf32>
    %c0_5 = arith.constant 0 : index
    %c0_6 = arith.constant 0 : index
    %6 = vector.load %arg4[%c0_5, %c0_6] : memref<8x128xf32, #tpu.memory_space<vmem>>, vector<8x128xf32>
    tpu.vector_store %arg4[%c0_5, %c0_6], %5 {strides = array<i32>} : memref<8x128xf32, #tpu.memory_space<vmem>>, vector<8x128xf32>,
    return
  }
  func.func @transform_0(%arg0: i32) -> (i32, i32) {
    %c0_i32 = arith.constant 0 : i32
    %c0_i32_0 = arith.constant 0 : i32
    return %arg0, %c0_i32 : i32, i32
  }
  func.func @transform_1(%arg0: i32) -> (i32, i32) {
    %c0_i32 = arith.constant 0 : i32
    %c0_i32_0 = arith.constant 0 : i32
    %c0_i32_1 = arith.constant 0 : i32
    return %c0_i32, %c0_i32_0 : i32, i32
  }
  func.func @transform_2(%arg0: i32) -> (i32, i32) {
    %c0_i32 = arith.constant 0 : i32
    %c0_i32_0 = arith.constant 0 : i32
    %c0_i32_1 = arith.constant 0 : i32
    return %c0_i32, %c0_i32_0 : i32, i32
  }
  func.func @transform_3(%arg0: i32) -> (i32, i32) {
    %c0_i32 = arith.constant 0 : i32
    %c0_i32_0 = arith.constant 0 : i32
    return %arg0, %c0_i32 : i32, i32
  }
}

</mosaic_0001>

<bundles_post_ra>
// kernel: tpu_custom_call.1
= control target key start
LH: loop header
LB: loop body
LE: loop exit
PB: predicated region body
PF: predicated region fallthrough
CT: control target
= control target key end

     0   :  { %8 = vsyncpa [#allocation3], 0  ;;  %s296_s0 = inlined_call_operand.hbm [shape: bf16[8,32], index: 0, kind: input, shape index: {}]   ;;  %s297_s1 = inlined_call_operand.hbm [shape: bf16[32,128], index: 1, kind: input, shape index: {}]   ;;  %s298_s2 = inlined_call_operand.vmem [shape: f32[1,128], index: 2, kind: input, shape index: {}]   ;;  %s299_s3 = inlined_call_operand.hbm [shape: f32[8,128], index: 3, kind: output, shape index: {}]  }
   0x1   :  { %9 = vsyncpa [#allocation6], 0 }
   0x2   :  { %10 = vsyncpa [#allocation4], 0  ;;  %s223_s12 = smov [#allocation2]   ;;  %s224_s14 = smov [#allocation5]  }
   0x3   :  { %s17_s13 = sshll.u32 %s223_s12, 4  ;;  %s26_s15 = sshll.u32 %s224_s14, 4  ;;  %s18_s13 = int_to_ptr.vmem [resolvable:$true] %s17_s13  ;;  %s250_s15 = int_to_ptr.vmem [resolvable:$true] %s26_s15 }
   0x4   :  { %s151_s18 = scalar_lea.hbm %s296_s0, 64 }
   0x5   :  { %p152_p0 = scmp.ne.s32.totalorder %s296_s0, %s151_s18  ;;  %p155_p1 = scmp.lt.u32.totalorder %s151_s18, %s296_s0 }
   0x7   :  { %p157_p2 = pnand %p155_p1, %p152_p0 }
   0x9   :  { %160 = shalt.err (!%p157_p2)
}
   0xa   :  { %s161_s23 = scalar_lea.vmem %s18_s13, 64  ;;  %p166_p4 = scmp.lt.s32.totalorder %s18_s13, %s18_s13 }
   0xb   :  { %p162_p3 = scmp.ne.s32.totalorder %s18_s13, %s161_s23  ;;  %p167_p5 = scmp.lt.s32.totalorder %s161_s23, %s161_s23 }
   0xd   :  { %p168_p6 = por %p167_p5, %p166_p4 }
   0xf   :  { %p169_p7 = pnand %p168_p6, %p162_p3 }
  0x11   :  { %172 = shalt.err (!%p169_p7)
}
  0x12   :  { %20 = dma.hbm_to_vmem [thread:$0]  %s296_s0, 64, %s18_s13, [#allocation3]  }
  0x13   :  { %s173_s28 = scalar_lea.hbm %s297_s1, 256 }
  0x14   :  { %p174_p8 = scmp.ne.s32.totalorder %s297_s1, %s173_s28  ;;  %p177_p9 = scmp.lt.u32.totalorder %s173_s28, %s297_s1 }
  0x16   :  { %p179_p10 = pnand %p177_p9, %p174_p8 }
  0x18   :  { %182 = shalt.err (!%p179_p10)
}
  0x19   :  { %s183_s6 = scalar_lea.vmem %s250_s15, 256  ;;  %p188_p12 = scmp.lt.s32.totalorder %s250_s15, %s250_s15 }
  0x1a   :  { %p184_p11 = scmp.ne.s32.totalorder %s250_s15, %s183_s6  ;;  %p189_p13 = scmp.lt.s32.totalorder %s183_s6, %s183_s6 }
  0x1c   :  { %p190_p0 = por %p189_p13, %p188_p12 }
  0x1e   :  { %p191_p1 = pnand %p190_p0, %p184_p11 }
  0x20   :  { %194 = shalt.err (!%p191_p1)
}
  0x21   :  { %s225_s0 = smov 64   ;;  %s226_s7 = smov 4  }
  0x22   :  { %32 = dma.hbm_to_vmem [thread:$0]  %s297_s1, 256, %s250_s15, [#allocation6], %s225_s0, %s225_s0, %s226_s7  }
  0x23   :  { %217 = dma.done.wait [#allocation3], 64  }
  0x24   :  { %218 = vsyncadd [#allocation3], 4294967232 }
  0x25   :  { %219 = dma.done.wait [#allocation6], 256  }
  0x26   :  { %220 = vsyncadd [#allocation6], 4294967040  ;;  %v227_v0 = vmov 0.0   ;;  %vm228_vm0 = vmmov 0   ;;  %v149_v1 = vld [vmem:[#allocation5] sm:$0xff]   ;;  %v150_v2 = vld [vmem:[#allocation5 + $0x8] sm:$0xff]  }
  0x27   :  { %134 = vmatprep.subr.bf16.mxu0 %v227_v0  ;;  %138 = vmatprep.mubr.msk.bf16.mxu0 %vm228_vm0, %v227_v0  ;;  %v42_v3 = vld [vmem:[#allocation2] sm:$0xf]  ;;  %vm66_vm1 = vcmask 261120   ;;  %s229_s1 = smov [#allocation7]  }
  0x28   :  { %135 = vmatpush3.bf16.msra.mxu0 %v149_v1  ;;  %v127_v4 = vld [vmem:[%s298_s2] ss:$0 sm:$0xff]  ;;  %s117_s12 = sshll.u32 %s229_s1, 4  ;;  %s118_s12 = int_to_ptr.vmem [resolvable:$true] %s117_s12 }
  0x29   :  { %136 = vmatprep.subr.bf16.mxu0 %v227_v0  ;;  %s195_s13 = scalar_lea.vmem %s118_s12, 128  ;;  %p200_p3 = scmp.lt.s32.totalorder %s118_s12, %s118_s12 }
  0x2a   :  { %p196_p2 = scmp.ne.s32.totalorder %s118_s12, %s195_s13  ;;  %p201_p4 = scmp.lt.s32.totalorder %s195_s13, %s195_s13 }
  0x2c   :  { %137 = vmatpush3.bf16.msra.mxu0 %v150_v2  ;;  %p202_p5 = por %p201_p4, %p200_p3 }
  0x2e   :  { %p203_p6 = pnand %p202_p5, %p196_p2 }
  0x2f   :  { %139 = vmatmul.mubr.msk.bf16.vlgmr.msra.gmra.mrb[0].mxu0 %vm66_vm1, %v42_v3 }
 0x102   :  { %v104_v5 = vpop.f32.mrb[0].mxu0 }
 0x103   :  { %v105_v6 = vadd.f32 %v127_v4, %v104_v5  ;;  %v140_v7 = vpop.f32.mrb[1].mxu0 }
 0x104   :  { %v107_v8 = vpop.f32.mrb[2].mxu0 }
 0x105   :  { %110 = vst [vmem:[#allocation7] sm:$0xff] %v105_v6  ;;  %v141_v9 = vpop.f32.mrb[3].mxu0 }
 0x106   :  { %206 = shalt.err (!%p203_p6)
}
 0x107   :  { %s207_s2 = scalar_lea.hbm %s299_s3, 128 }
 0x108   :  { %p208_p7 = scmp.ne.s32.totalorder %s299_s3, %s207_s2  ;;  %p211_p8 = scmp.lt.u32.totalorder %s207_s2, %s299_s3 }
 0x10a   :  { %p213_p9 = pnand %p211_p8, %p208_p7 }
 0x10c   :  { %216 = shalt.err (!%p213_p9)
}
 0x10d   :  { %120 = dma.vmem_to_hbm [thread:$0]  %s118_s12, 128, %s299_s3, [#allocation4]  }
 0x10e   :  { %221 = dma.done.wait [#allocation4], 128  }
 0x10f   :  { %222 = vsyncadd [#allocation4], 4294967168 }
 0x110   :  { %124 = vsyncpa [#allocation3], 1 }
 0x111   :  { %125 = vsyncpa [#allocation6], 1 }
 0x112   :  { %126 = vsyncpa [#allocation4], 1 }

</bundles_post_ra>
